<compile_context>
chip_gen: v7x
topology: tpu7x:2x2x1
jax: 0.10.0
libtpu: 0.0.40
codegen_flags: <defaults>
</compile_context>

<pallas_src>
import functools

import jax
import jax.numpy as jnp
from jax.experimental import pallas as pl
from jax.experimental.pallas import tpu as pltpu

_EPS2 = 1e-24  # (F.normalize default eps = 1e-12) squared


def _ntxent_kernel(x_full_ref, x_q_ref, out_ref, *, inv_temp):
    """One query-row block of the NT-Xent loss.

    x_full_ref : (2B, D) raw embeddings (concat of emb_i, emb_j), VMEM resident
                 across all grid steps (index_map is constant -> loaded once).
    x_q_ref    : (TQ, D) this block's query rows (a row-block of the same array).
    out_ref    : (8, 128) lane-dense tile filled with this block's partial loss
                 sum (the wrapper reads element [0, 0] of each tile).
    """
    n, _ = x_full_ref.shape
    b = n // 2
    q = pl.program_id(0)

    # --- Row L2-normalization (F.normalize, dim=1): rsqrt multiply, no divides.
    # Re-normalizing the resident key block per step is O(2B*D) VPU/EUP work,
    # negligible next to the O(TQ*2B*D) MXU matmul of the step.
    x = x_full_ref[...].astype(jnp.float32)                          # (2B, D)
    z = x * jax.lax.rsqrt(
        jnp.maximum(jnp.sum(x * x, axis=1, keepdims=True), _EPS2))
    zb = z.astype(jnp.bfloat16)                                      # keys, bf16 for MXU

    xq = x_q_ref[...].astype(jnp.float32)                            # (TQ, D)
    zq = xq * jax.lax.rsqrt(
        jnp.maximum(jnp.sum(xq * xq, axis=1, keepdims=True), _EPS2))
    zq_b = zq.astype(jnp.bfloat16)

    # --- (TQ, 2B) cosine-similarity slab on the MXU (bf16 inputs, f32 accumulate).
    sim = jax.lax.dot_general(
        zq_b, zb, (((1,), (1,)), ((), ())),
        preferred_element_type=jnp.float32)                          # (TQ, 2B)

    # --- Denominator: row-sum of exp minus the self-similarity term (no ~eye mask).
    e = jnp.exp(sim * inv_temp)                                      # (TQ, 2B)
    row_sum = jnp.sum(e, axis=1, keepdims=True)                      # (TQ, 1)
    zq32 = zq_b.astype(jnp.float32)
    self_sim = jnp.sum(zq32 * zq32, axis=1, keepdims=True)           # == diag(sim) rows
    denom = row_sum - jnp.exp(self_sim * inv_temp)                   # (TQ, 1)

    partial = jnp.sum(jnp.log(denom), axis=(0, 1), keepdims=True)    # (1, 1)

    # --- Positives: pos_k = z_k . z_{(k+B) mod 2B}. Their total contribution is
    # 2 * sum(z[:B] * z[B:]) (f32, O(2B*D)); add it exactly once, on block 0.
    pos_total = 2.0 * jnp.sum(z[:b] * z[b:], axis=(0, 1), keepdims=True)
    is_first = (q == 0).astype(jnp.float32)
    partial = partial - is_first * (inv_temp * pos_total)

    # Lane-dense, (8,128)-aligned store of the per-block partial.
    out_ref[...] = jnp.broadcast_to(partial, out_ref.shape)


def _pick_block_q(n):
    """Largest query-row block that divides 2B, is sublane-aligned (multiple of 8)
    and keeps the (TQ, 2B) slab modest; falls back to the whole problem."""
    for tq in (256, 128, 64, 32, 16, 8):
        if n % tq == 0:
            return tq
    return n  # tiny / odd batches: single block covering the full array


def contrastive_loss(emb_i, emb_j, temperature=0.5):
    """emb_i, emb_j: (B, D) float arrays. Returns the scalar NT-Xent loss."""
    assert emb_i.shape == emb_j.shape and emb_i.ndim == 2
    bsz, dim = emb_i.shape
    n = 2 * bsz

    # Concat in the wrapper (avoids in-kernel sublane concat/relayout).
    x = jnp.concatenate([emb_i, emb_j], axis=0).astype(jnp.float32)  # (2B, D)

    tq = _pick_block_q(n)
    g = n // tq
    # temperature is a constructor-time buffer -> bake 1/T in as a static scalar.
    inv_temp = 1.0 / float(temperature)

    kernel = functools.partial(_ntxent_kernel, inv_temp=inv_temp)
    out = pl.pallas_call(
        kernel,
        out_shape=jax.ShapeDtypeStruct((8 * g, 128), jnp.float32),
        grid=(g,),
        in_specs=[
            pl.BlockSpec((n, dim), lambda i: (0, 0)),    # full Z: resident key side
            pl.BlockSpec((tq, dim), lambda i: (i, 0)),   # query row block
        ],
        out_specs=pl.BlockSpec((8, 128), lambda i: (i, 0)),
        compiler_params=pltpu.CompilerParams(
            dimension_semantics=("parallel",),           # v7x: 2 TCs split row blocks
            vmem_limit_bytes=32 * 1024 * 1024,
        ),
    )(x, x)

    partials = out[0::8, 0]                              # one scalar per row block
    return jnp.sum(partials) / n


def _reference_loss(emb_i, emb_j, temperature=0.5):
    # Pure-JAX f32 mirror of the PyTorch forward, for verification.
    zi = emb_i / jnp.maximum(jnp.linalg.norm(emb_i, axis=1, keepdims=True), 1e-12)
    zj = emb_j / jnp.maximum(jnp.linalg.norm(emb_j, axis=1, keepdims=True), 1e-12)
    z = jnp.concatenate([zi, zj], axis=0)
    sim = z @ z.T
    b = emb_i.shape[0]
    n = 2 * b
    neg_mask = 1.0 - jnp.eye(n, dtype=jnp.float32)
    positives = jnp.concatenate([jnp.diag(sim, b), jnp.diag(sim, -b)], axis=0)
    nominator = jnp.exp(positives / temperature)
    denom = jnp.sum(neg_mask * jnp.exp(sim / temperature), axis=1)
    return jnp.sum(-jnp.log(nominator / denom)) / n


if __name__ == "__main__":
    key = jax.random.PRNGKey(0)
    k1, k2 = jax.random.split(key)
    B, D = 4, 32
    emb_i = jax.random.normal(k1, (B, D), dtype=jnp.float32)
    emb_j = jax.random.normal(k2, (B, D), dtype=jnp.float32)

    loss = contrastive_loss(emb_i, emb_j, temperature=0.5)
    loss = jax.block_until_ready(loss)

    ref = _reference_loss(emb_i, emb_j, temperature=0.5)
    # Similarities go through the MXU in bf16 (f32 accumulate), so the comparison
    # against the pure-f32 reference uses a correspondingly looser tolerance
    # (observed error ~1e-3 on a loss of magnitude ~2).
    assert jnp.allclose(loss, ref, atol=1e-2, rtol=1e-2), (loss, ref)

    print("KERNEL_OK")
</pallas_src>

<mosaic_0001>
module attributes {stable_mosaic.version = 11 : i64} {
  func.func @_ntxent_kernel(%arg0: i32, %arg1: memref<8x32xf32, #tpu.memory_space<vmem>>, %arg2: memref<8x32xf32, #tpu.memory_space<vmem>>, %arg3: memref<8x128xf32, #tpu.memory_space<vmem>>) attributes {dimension_semantics = [#tpu.dimension_semantics<parallel>], iteration_bounds = array<i64: 1>, scalar_prefetch = 0 : i64, scratch_operands = 0 : i64, tpu.core_type = #tpu.core_type<tc>, window_params = [{pipeline_mode = #tpu.pipeline_mode<synchronous>, transform_indices = @transform_0, window_bounds = array<i64: 8, 32>}, {transform_indices = @transform_1, window_bounds = array<i64: 8, 32>}, {transform_indices = @transform_2, window_bounds = array<i64: 8, 128>}]} {
    %c0 = arith.constant 0 : index
    %c0_0 = arith.constant 0 : index
    %0 = vector.load %arg1[%c0, %c0_0] : memref<8x32xf32, #tpu.memory_space<vmem>>, vector<8x32xf32>
    %1 = arith.mulf %0, %0 : vector<8x32xf32>
    %cst = arith.constant dense<0.000000e+00> : vector<8xf32>
    %2 = vector.multi_reduction <add>, %1, %cst [1] : vector<8x32xf32> to vector<8xf32>
    %3 = vector.shape_cast %2 : vector<8xf32> to vector<8x1xf32>
    %cst_1 = arith.constant 1.000000e-24 : f32
    %4 = vector.broadcast %cst_1 : f32 to vector<8x1xf32>
    %5 = arith.maximumf %3, %4 : vector<8x1xf32>
    %6 = math.rsqrt %5 : vector<8x1xf32>
    %7 = vector.broadcast %6 : vector<8x1xf32> to vector<8x32xf32>
    %8 = arith.mulf %0, %7 : vector<8x32xf32>
    %9 = arith.truncf %8 : vector<8x32xf32> to vector<8x32xbf16>
    %c0_2 = arith.constant 0 : index
    %c0_3 = arith.constant 0 : index
    %10 = vector.load %arg2[%c0_2, %c0_3] : memref<8x32xf32, #tpu.memory_space<vmem>>, vector<8x32xf32>
    %11 = arith.mulf %10, %10 : vector<8x32xf32>
    %cst_4 = arith.constant dense<0.000000e+00> : vector<8xf32>
    %12 = vector.multi_reduction <add>, %11, %cst_4 [1] : vector<8x32xf32> to vector<8xf32>
    %13 = vector.shape_cast %12 : vector<8xf32> to vector<8x1xf32>
    %cst_5 = arith.constant 1.000000e-24 : f32
    %14 = vector.broadcast %cst_5 : f32 to vector<8x1xf32>
    %15 = arith.maximumf %13, %14 : vector<8x1xf32>
    %16 = math.rsqrt %15 : vector<8x1xf32>
    %17 = vector.broadcast %16 : vector<8x1xf32> to vector<8x32xf32>
    %18 = arith.mulf %10, %17 : vector<8x32xf32>
    %19 = arith.truncf %18 : vector<8x32xf32> to vector<8x32xbf16>
    %cst_6 = arith.constant dense<0.000000e+00> : vector<8x8xf32>
    %20 = tpu.matmul %19, %9, %cst_6 {dimension_numbers = #tpu.dot_dimension_numbers<[1], [1], [0], [0], [0, 0, 1, 0], [], []>} : vector<8x32xbf16>, vector<8x32xbf16>, vector<8x8xf32> -> vector<8x8xf32>
    %cst_7 = arith.constant 2.000000e+00 : f32
    %21 = vector.broadcast %cst_7 : f32 to vector<8x8xf32>
    %22 = arith.mulf %20, %21 : vector<8x8xf32>
    %23 = math.exp %22 : vector<8x8xf32>
    %cst_8 = arith.constant dense<0.000000e+00> : vector<8xf32>
    %24 = vector.multi_reduction <add>, %23, %cst_8 [1] : vector<8x8xf32> to vector<8xf32>
    %25 = vector.shape_cast %24 : vector<8xf32> to vector<8x1xf32>
    %26 = arith.extf %19 : vector<8x32xbf16> to vector<8x32xf32>
    %27 = arith.mulf %26, %26 : vector<8x32xf32>
    %cst_9 = arith.constant dense<0.000000e+00> : vector<8xf32>
    %28 = vector.multi_reduction <add>, %27, %cst_9 [1] : vector<8x32xf32> to vector<8xf32>
    %29 = vector.shape_cast %28 : vector<8xf32> to vector<8x1xf32>
    %cst_10 = arith.constant 2.000000e+00 : f32
    %30 = vector.broadcast %cst_10 : f32 to vector<8x1xf32>
    %31 = arith.mulf %29, %30 : vector<8x1xf32>
    %32 = math.exp %31 : vector<8x1xf32>
    %33 = arith.subf %25, %32 : vector<8x1xf32>
    %34 = math.log %33 : vector<8x1xf32>
    %35 = vector.shape_cast %34 : vector<8x1xf32> to vector<1x8x1xf32>
    %cst_11 = arith.constant dense<0.000000e+00> : vector<1xf32>
    %36 = vector.multi_reduction <add>, %35, %cst_11 [1, 2] : vector<1x8x1xf32> to vector<1xf32>
    %37 = vector.shape_cast %36 : vector<1xf32> to vector<1x1x1xf32>
    %38 = vector.extract %37[0, 0, 0] : f32 from vector<1x1x1xf32>
    %39 = vector.broadcast %38 : f32 to vector<1x1xf32>
    %40 = vector.extract_strided_slice %8 {offsets = [0, 0], sizes = [4, 32], strides = [1, 1]} : vector<8x32xf32> to vector<4x32xf32>
    %41 = vector.extract_strided_slice %8 {offsets = [4, 0], sizes = [4, 32], strides = [1, 1]} : vector<8x32xf32> to vector<4x32xf32>
    %42 = arith.mulf %40, %41 : vector<4x32xf32>
    %43 = vector.shape_cast %42 : vector<4x32xf32> to vector<1x4x32xf32>
    %cst_12 = arith.constant dense<0.000000e+00> : vector<1xf32>
    %44 = vector.multi_reduction <add>, %43, %cst_12 [1, 2] : vector<1x4x32xf32> to vector<1xf32>
    %45 = vector.shape_cast %44 : vector<1xf32> to vector<1x1x1xf32>
    %46 = vector.extract %45[0, 0, 0] : f32 from vector<1x1x1xf32>
    %47 = vector.broadcast %46 : f32 to vector<1x1xf32>
    %cst_13 = arith.constant 2.000000e+00 : f32
    %48 = vector.broadcast %cst_13 : f32 to vector<1x1xf32>
    %49 = arith.mulf %48, %47 : vector<1x1xf32>
    %c0_i32 = arith.constant 0 : i32
    %50 = arith.cmpi eq, %arg0, %c0_i32 : i32
    %51 = arith.extui %50 : i1 to i32
    %52 = arith.sitofp %51 : i32 to f32
    %cst_14 = arith.constant 2.000000e+00 : f32
    %53 = vector.broadcast %cst_14 : f32 to vector<1x1xf32>
    %54 = arith.mulf %53, %49 : vector<1x1xf32>
    %55 = vector.broadcast %52 : f32 to vector<1x1xf32>
    %56 = arith.mulf %55, %54 : vector<1x1xf32>
    %57 = arith.subf %39, %56 : vector<1x1xf32>
    %58 = vector.shape_cast %57 : vector<1x1xf32> to vector<1x1xf32>
    %59 = vector.broadcast %58 : vector<1x1xf32> to vector<8x128xf32>
    %c0_15 = arith.constant 0 : index
    %c0_16 = arith.constant 0 : index
    %60 = vector.load %arg3[%c0_15, %c0_16] : memref<8x128xf32, #tpu.memory_space<vmem>>, vector<8x128xf32>
    tpu.vector_store %arg3[%c0_15, %c0_16], %59 {strides = array<i32>} : memref<8x128xf32, #tpu.memory_space<vmem>>, vector<8x128xf32>,
    return
  }
  func.func @transform_0(%arg0: i32) -> (i32, i32) {
    %c0_i32 = arith.constant 0 : i32
    %c0_i32_0 = arith.constant 0 : i32
    %c0_i32_1 = arith.constant 0 : i32
    return %c0_i32, %c0_i32_0 : i32, i32
  }
  func.func @transform_1(%arg0: i32) -> (i32, i32) {
    %c0_i32 = arith.constant 0 : i32
    %c0_i32_0 = arith.constant 0 : i32
    return %arg0, %c0_i32 : i32, i32
  }
  func.func @transform_2(%arg0: i32) -> (i32, i32) {
    %c0_i32 = arith.constant 0 : i32
    %c0_i32_0 = arith.constant 0 : i32
    return %arg0, %c0_i32 : i32, i32
  }
}

</mosaic_0001>

<bundles_post_ra>
// kernel: tpu_custom_call.1
= control target key start
LH: loop header
LB: loop body
LE: loop exit
PB: predicated region body
PF: predicated region fallthrough
CT: control target
= control target key end

     0   :  { %7 = vsyncpa [#allocation3], 0  ;;  %s334_s0 = inlined_call_operand.hbm [shape: f32[8,32], index: 0, kind: input, shape index: {}]   ;;  %s335_s1 = inlined_call_operand.hbm [shape: f32[8,32], index: 1, kind: input, shape index: {}]   ;;  %s336_s2 = inlined_call_operand.hbm [shape: f32[8,128], index: 2, kind: output, shape index: {}]  }
   0x1   :  { %8 = vsyncpa [#allocation6], 0 }
   0x2   :  { %9 = vsyncpa [#allocation4], 0  ;;  %s273_s9 = smov [#allocation2]   ;;  %s274_s11 = smov [#allocation5]  }
   0x3   :  { %s16_s10 = sshll.u32 %s273_s9, 4  ;;  %s26_s12 = sshll.u32 %s274_s11, 4  ;;  %s17_s10 = int_to_ptr.vmem [resolvable:$true] %s16_s10  ;;  %s27_s12 = int_to_ptr.vmem [resolvable:$true] %s26_s12 }
   0x4   :  { %s201_s15 = scalar_lea.hbm %s334_s0, 128 }
   0x5   :  { %p202_p0 = scmp.ne.s32.totalorder %s334_s0, %s201_s15  ;;  %p205_p1 = scmp.lt.u32.totalorder %s201_s15, %s334_s0 }
   0x7   :  { %p207_p2 = pnand %p205_p1, %p202_p0 }
   0x9   :  { %210 = shalt.err (!%p207_p2)
}
   0xa   :  { %s211_s20 = scalar_lea.vmem %s17_s10, 128  ;;  %p216_p4 = scmp.lt.s32.totalorder %s17_s10, %s17_s10 }
   0xb   :  { %p212_p3 = scmp.ne.s32.totalorder %s17_s10, %s211_s20  ;;  %p217_p5 = scmp.lt.s32.totalorder %s211_s20, %s211_s20 }
   0xd   :  { %p218_p6 = por %p217_p5, %p216_p4 }
   0xf   :  { %p219_p7 = pnand %p218_p6, %p212_p3 }
  0x11   :  { %222 = shalt.err (!%p219_p7)
}
  0x12   :  { %19 = dma.hbm_to_vmem [thread:$0]  %s334_s0, 128, %s17_s10, [#allocation3]  }
  0x13   :  { %s223_s25 = scalar_lea.hbm %s335_s1, 128 }
  0x14   :  { %p224_p8 = scmp.ne.s32.totalorder %s335_s1, %s223_s25  ;;  %p227_p9 = scmp.lt.u32.totalorder %s223_s25, %s335_s1 }
  0x16   :  { %p229_p10 = pnand %p227_p9, %p224_p8 }
  0x18   :  { %232 = shalt.err (!%p229_p10)
}
  0x19   :  { %s233_s30 = scalar_lea.vmem %s27_s12, 128  ;;  %p238_p12 = scmp.lt.s32.totalorder %s27_s12, %s27_s12 }
  0x1a   :  { %p234_p11 = scmp.ne.s32.totalorder %s27_s12, %s233_s30  ;;  %p239_p13 = scmp.lt.s32.totalorder %s233_s30, %s233_s30 }
  0x1c   :  { %p240_p0 = por %p239_p13, %p238_p12 }
  0x1e   :  { %p241_p1 = pnand %p240_p0, %p234_p11 }
  0x20   :  { %244 = shalt.err (!%p241_p1)
}
  0x21   :  { %29 = dma.hbm_to_vmem [thread:$0]  %s335_s1, 128, %s27_s12, [#allocation6]  }
  0x22   :  { %267 = dma.done.wait [#allocation3], 128  }
  0x23   :  { %268 = vsyncadd [#allocation3], 4294967168 }
  0x24   :  { %269 = dma.done.wait [#allocation6], 128  }
  0x25   :  { %270 = vsyncadd [#allocation6], 4294967168  ;;  %v37_v0 = vld [vmem:[#allocation2] sm:$0xff]  ;;  %vm39_vm0 = vcmask 261120   ;;  %v47_v1 = vld [vmem:[#allocation5] sm:$0xff]  ;;  %v275_v6 = vmov 0.0  }
  0x26   :  { %v38_v2 = vmul.f32 %v37_v0, %v37_v0  ;;  %v48_v3 = vmul.f32 %v47_v1, %v47_v1  ;;  %176 = vmatprep.subr.bf16.mxu0 %v275_v6  ;;  %vm276_vm1 = vmmov 0   ;;  %vm105_vm2 = vcmask 64512   ;;  %s277_s5 = smov [#allocation7]  }
  0x27   :  { %178 = vmatprep.mubr.msk.bf16.mxu0 %vm276_vm1, %v275_v6  ;;  %vm136_vm3 = vcmask 257024   ;;  %vm120_vm4 = vcmask 7168   ;;  %s163_s6 = sshll.u32 %s277_s5, 4  ;;  %s164_s6 = int_to_ptr.vmem [resolvable:$true] %s163_s6 }
  0x28   :  { %v40_v4 = vsel %vm39_vm0, %v38_v2, 0.0  ;;  %v49_v5 = vsel %vm39_vm0, %v48_v3, 0.0  ;;  %s245_s7 = scalar_lea.vmem %s164_s6, 128  ;;  %p250_p3 = scmp.lt.s32.totalorder %s164_s6, %s164_s6 }
  0x29   :  { %41 = vadd.xlane.f32.xlu0 %v40_v4  ;;  %p246_p2 = scmp.ne.s32.totalorder %s164_s6, %s245_s7  ;;  %p251_p4 = scmp.lt.s32.totalorder %s245_s7, %s245_s7 }
  0x2b   :  { %p252_p5 = por %p251_p4, %p250_p3 }
  0x2d   :  { %50 = vadd.xlane.f32.xlu0 %v49_v5  ;;  %p253_p6 = pnand %p252_p5, %p246_p2 }
  0xb6   :  { %v42_v7 = vpop.xlane.xlu0 %41 }
  0xb7   :  { %v43_v8 = vmax.f32 %v42_v7, 1e-24 }
  0xb9   :  { %191 = vrsqrt.f32 %v43_v8 }
  0xba   :  { %v51_v9 = vpop.xlane.xlu0 %50 }
  0xbb   :  { %v52_v10 = vmax.f32 %v51_v9, 1e-24 }
  0xbd   :  { %193 = vrsqrt.f32 %v52_v10 }
  0xc3   :  { %v192_v11 = vpop.eup %191 }
  0xc4   :  { %v45_v12 = vmul.f32 %v192_v11, %v37_v0 }
  0xc6   :  { %v46_v13 = vpack.c.bf16 %v45_v12, %v45_v12  ;;  %v133_v27 = vrot.slane %v45_v12, 4 }
  0xc7   :  { %v194_v14 = vpop.eup %193 }
  0xc8   :  { %v60_v15 = vsel %vm39_vm0, %v46_v13, 0  ;;  %v54_v16 = vmul.f32 %v194_v14, %v47_v1  ;;  %v135_v30 = vmul.f32 %v133_v27, %v45_v12 }
  0xc9   :  { %177 = vmatpush3.bf16.xpose.msra.mxu0 %v60_v15 }
  0xca   :  { %v55_v17 = vpack.c.bf16 %v54_v16, %v54_v16  ;;  %v137_v31 = vsel %vm136_vm3, %v135_v30, 0.0 }
  0xcc   :  { %v109_v18 = vunpack.c.l.bf16 %v55_v17 }
  0xce   :  { %v110_v19 = vmul.f32 %v109_v18, %v109_v18 }
  0xd0   :  { %179 = vmatmul.mubr.msk.bf16.vlgmr.msra.gmra.mrb[0].mxu0 %vm39_vm0, %v55_v17  ;;  %v111_v20 = vsel %vm39_vm0, %v110_v19, 0.0 }
  0xd1   :  { %112 = vadd.xlane.f32.xlu1 %v111_v20 }
 0x15e   :  { %v113_v32 = vpop.xlane.xlu1 %112 }
 0x15f   :  { %v114_v33 = vmul.f32 2.0, %v113_v32 }
 0x161   :  { %v115_v34 = vmul.f32 1.442695, %v114_v33 }
 0x1a3   :  { %v96_v21 = vpop.f32.mrb[0].mxu0 }
 0x1a4   :  { %v102_v22 = vmul.f32 2.0, %v96_v21  ;;  %v180_v23 = vpop.f32.mrb[1].mxu0 }
 0x1a5   :  { %v99_v24 = vpop.f32.mrb[2].mxu0 }
 0x1a6   :  { %v103_v25 = vmul.f32 1.442695, %v102_v22  ;;  %v181_v26 = vpop.f32.mrb[3].mxu0 }
 0x1a8   :  { %195 = vpow2.f32 %v103_v25 }
 0x1a9   :  { %197 = vpow2.f32 %v115_v34 }
 0x1b2   :  { %v196_v28 = vpop.eup %195 }
 0x1b3   :  { %v106_v29 = vsel %vm105_vm2, %v196_v28, 0.0  ;;  %v198_v35 = vpop.eup %197 }
 0x1b4   :  { %107 = vadd.xlane.f32.xlu1 %v106_v29 }
 0x1b8   :  { %138 = vadd.xlane.f32.xlu1 %v137_v31 }
 0x241   :  { %v108_v36 = vpop.xlane.xlu1 %107 }
 0x242   :  { %v117_v37 = vsub.f32 %v108_v36, %v198_v35 }
 0x244   :  { %199 = vlog2.f32 %v117_v37 }
 0x245   :  { %v139_v41 = vpop.xlane.xlu1 %138 }
 0x246   :  { %v140_v42 = vrot.slane %v139_v41, 4 }
 0x248   :  { %v141_v43 = vadd.f32 %v140_v42, %v139_v41 }
 0x24a   :  { %v142_v44 = vrot.slane %v141_v43, 2 }
 0x24c   :  { %v143_v48 = vadd.f32 %v142_v44, %v141_v43 }
 0x24e   :  { %v200_v38 = vpop.eup %199  ;;  %v144_v51 = vrot.slane %v143_v48, 1 }
 0x24f   :  { %v119_v39 = vmul.f32 0.6931472, %v200_v38 }
 0x250   :  { %v145_v54 = vadd.f32 %v144_v51, %v143_v48 }
 0x251   :  { %v121_v40 = vsel %vm120_vm4, %v119_v39, 0.0 }
 0x252   :  { %122 = vadd.xlane.f32.xlu0 %v121_v40 }
 0x2df   :  { %v123_v45 = vpop.xlane.xlu0 %122 }
 0x2e0   :  { %v124_v46 = vrot.slane %v123_v45, 4 }
 0x2e2   :  { %v125_v47 = vadd.f32 %v124_v46, %v123_v45 }
 0x2e4   :  { %v126_v49 = vrot.slane %v125_v47, 2 }
 0x2e6   :  { %v127_v50 = vadd.f32 %v126_v49, %v125_v47 }
 0x2e8   :  { %v128_v52 = vrot.slane %v127_v50, 1 }
 0x2ea   :  { %v129_v53 = vadd.f32 %v128_v52, %v127_v50 }
 0x2ec   :  { %182 = vpush %v129_v53 }
 0x2ed   :  { %184 = vpush %v145_v54 }
 0x31d   :  { %s183_s1 = spop %182 }
 0x31e   :  { %s185_s4 = spop %184  ;;  %v131_v58 = vstv %s183_s1 }
 0x31f   :  { %v147_v55 = vstv %s185_s4 }
 0x320   :  { %v148_v56 = vmul.f32 2.0, %v147_v55 }
 0x322   :  { %v152_v57 = vmul.f32 2.0, %v148_v56 }
 0x324   :  { %v155_v59 = vsub.f32 %v131_v58, %v152_v57 }
 0x326   :  { %156 = vst [vmem:[#allocation7] sm:$0xff] %v155_v59 }
 0x327   :  { %256 = shalt.err (!%p253_p6)
}
 0x328   :  { %s257_s10 = scalar_lea.hbm %s336_s2, 128 }
 0x329   :  { %p258_p7 = scmp.ne.s32.totalorder %s336_s2, %s257_s10  ;;  %p261_p8 = scmp.lt.u32.totalorder %s257_s10, %s336_s2 }
 0x32b   :  { %p263_p9 = pnand %p261_p8, %p258_p7 }
 0x32d   :  { %266 = shalt.err (!%p263_p9)
}
 0x32e   :  { %166 = dma.vmem_to_hbm [thread:$0]  %s164_s6, 128, %s336_s2, [#allocation4]  }
 0x32f   :  { %271 = dma.done.wait [#allocation4], 128  }
 0x330   :  { %272 = vsyncadd [#allocation4], 4294967168 }
 0x331   :  { %170 = vsyncpa [#allocation3], 1 }
 0x332   :  { %171 = vsyncpa [#allocation6], 1 }
 0x333   :  { %172 = vsyncpa [#allocation4], 1 }

</bundles_post_ra>
